<compile_context>
chip_gen: v5e
topology: v5e:2x2
jax: 0.10.0
libtpu: 0.0.40
codegen_flags: <defaults>
</compile_context>

<pallas_src>
import functools

import jax
import jax.numpy as jnp
from jax.experimental import pallas as pl
from jax.experimental.pallas import tpu as pltpu


def _round_up(x, m):
    return (x + m - 1) // m * m


def _num_tensorcores():
    """Best-effort TensorCore count per chip (v7x has 2, v5e/v6e have 1)."""
    try:
        kind = jax.devices()[0].device_kind.lower()
        if "v7" in kind:
            return 2
    except Exception:  # pragma: no cover - defensive, never fatal
        pass
    return 1


def _mlp_kernel(x_ref, w1_ref, b1_ref, w2_ref, b2_ref, o_ref):
    # Fused: ReLU(x @ W1 + b1) @ W2 + b2   (all in VMEM, f32 accumulation).
    x = x_ref[...]
    h = jnp.dot(x, w1_ref[...], preferred_element_type=jnp.float32)
    h = jnp.maximum(h + b1_ref[...], 0.0)           # bias + ReLU on the VPU, f32
    # NOTE: if weights are bf16 this downcasts the activation before the
    # second matmul (accumulation stays f32); with f32 weights it is a no-op.
    o = jnp.dot(h.astype(w2_ref.dtype), w2_ref[...],
                preferred_element_type=jnp.float32)
    o_ref[...] = (o + b2_ref[...]).astype(o_ref.dtype)


def _reference(feat, w1, b1, w2, b2):
    return jnp.maximum(feat @ w1 + b1, 0.0) @ w2 + b2


def projection_forward(feat, w1, b1, w2, b2, *, tile_m=None,
                       min_pallas_rows=2048,
                       vmem_budget_bytes=24 * 1024 * 1024):
    """feat: [N, d_in]; w1: [d_in, d_h]; b1: [d_h]; w2: [d_h, d_out]; b2: [d_out]."""
    n, d_in = feat.shape
    d_h = w1.shape[1]
    d_out = w2.shape[1]
    dtype = feat.dtype
    itemsize = jnp.dtype(dtype).itemsize

    # ---- tiny-batch fallback ------------------------------------------------
    # Below a few thousand rows the custom-call overhead dwarfs the work; let
    # fused XLA handle it.  Pass min_pallas_rows=0 to force the Pallas path.
    if n < min_pallas_rows:
        return _reference(feat, w1, b1, w2, b2).astype(dtype)

    b1_2d = b1.reshape(1, d_h)
    b2_2d = b2.reshape(1, d_out)

    # ---- row tile selection -------------------------------------------------
    if tile_m is None:
        tile_m = 4096                                    # amortize ~0.35us/step
        if _num_tensorcores() >= 2 and n >= 512:
            # keep >= 2 grid steps so dimension_semantics=("parallel",) can
            # shard across both v7x TensorCores.
            tile_m = min(tile_m, _round_up(pl.cdiv(n, 2), 256))
    # Never exceed the (rounded) batch; keep MXU-friendly multiples.
    tile_m = max(8, min(tile_m, _round_up(n, 8)))
    if tile_m >= 256:
        tile_m -= tile_m % 256                           # multiple of 256 (MXU M)
    else:
        tile_m = _round_up(tile_m, 8)                    # sublane multiple

    # Shrink the row tile until the (double-buffered) working set fits a
    # conservative VMEM budget (scoped default is 32 MiB; v7x physical 64 MiB).
    def _vmem_estimate(tm):
        io_tiles = 2 * tm * (d_in + d_out)               # double-buffered in/out
        weights = 2 * (d_in * d_h + d_h + d_h * d_out + d_out)
        interm = tm * d_h                                 # hidden activation
        return (io_tiles + weights + interm) * itemsize

    while tile_m > 8 and _vmem_estimate(tile_m) > vmem_budget_bytes:
        tile_m = max(8, _round_up(tile_m // 2, 8))

    # ---- ragged batch: zero-pad rows to the tile (only if needed) -----------
    # Padded output rows contain ReLU(b1)@W2+b2 garbage but are sliced away.
    n_p = _round_up(n, tile_m)
    feat_p = feat if n_p == n else jnp.pad(feat, ((0, n_p - n), (0, 0)))

    grid = (n_p // tile_m,)

    cost = pl.CostEstimate(
        flops=2 * n_p * (d_in * d_h + d_h * d_out),
        transcendentals=0,
        # Bytes the kernel actually DMAs (row-padded batch, real feature dims).
        bytes_accessed=itemsize * (n_p * d_in + n_p * d_out
                                   + d_in * d_h + d_h + d_h * d_out + d_out),
    )

    out_p = pl.pallas_call(
        _mlp_kernel,
        out_shape=jax.ShapeDtypeStruct((n_p, d_out), dtype),
        grid_spec=pltpu.PrefetchScalarGridSpec(
            num_scalar_prefetch=0,
            grid=grid,
            in_specs=[
                pl.BlockSpec((tile_m, d_in), lambda i: (i, 0)),   # feat rows
                pl.BlockSpec((d_in, d_h), lambda i: (0, 0)),      # W1 (resident)
                pl.BlockSpec((1, d_h), lambda i: (0, 0)),         # b1
                pl.BlockSpec((d_h, d_out), lambda i: (0, 0)),     # W2 (resident)
                pl.BlockSpec((1, d_out), lambda i: (0, 0)),       # b2
            ],
            out_specs=pl.BlockSpec((tile_m, d_out), lambda i: (i, 0)),
        ),
        compiler_params=pltpu.CompilerParams(
            dimension_semantics=("parallel",),
        ),
        cost_estimate=cost,
    )(feat_p, w1, b1_2d, w2, b2_2d)

    # Slice away row padding (no lane padding to remove).
    return out_p if n_p == n else out_p[:n]


def _torch_linear_init(key, fan_in, fan_out, dtype=jnp.float32):
    """Deterministic init matching torch.nn.Linear: U(-1/sqrt(fan_in), +1/sqrt(fan_in))."""
    kw, kb = jax.random.split(key)
    bound = 1.0 / jnp.sqrt(jnp.asarray(fan_in, dtype))
    w = jax.random.uniform(kw, (fan_in, fan_out), dtype, -bound, bound)
    b = jax.random.uniform(kb, (fan_out,), dtype, -bound, bound)
    return w, b


if __name__ == "__main__":
    # Shapes consistent with the module: Projection(flm_fl_o=32, pm_dim_1=64, pm_dim_2=16)
    flm_fl_o, pm_dim_1, pm_dim_2 = 32, 64, 16
    batch = 8

    key = jax.random.PRNGKey(0)
    k_x, k_l1, k_l2, k_x2 = jax.random.split(key, 4)

    feat = jax.random.normal(k_x, (batch, flm_fl_o), jnp.float32)
    w1, b1 = _torch_linear_init(k_l1, flm_fl_o, pm_dim_1)
    w2, b2 = _torch_linear_init(k_l2, pm_dim_1, pm_dim_2)

    ref = _reference(feat, w1, b1, w2, b2)

    # Force the Pallas path (the auto heuristic would fall back to jnp at this
    # tiny batch) so the kernel itself is exercised once.
    fwd = jax.jit(functools.partial(projection_forward, min_pallas_rows=0))
    out = jax.block_until_ready(fwd(feat, w1, b1, w2, b2))
    assert out.shape == (batch, pm_dim_2)
    assert jnp.allclose(out, ref, atol=1e-5, rtol=1e-5)

    # Ragged batch (not a multiple of the row tile) exercises the row-padding path.
    feat_ragged = jax.random.normal(k_x2, (6, flm_fl_o), jnp.float32)
    out_r = jax.block_until_ready(
        projection_forward(feat_ragged, w1, b1, w2, b2, min_pallas_rows=0))
    ref_r = _reference(feat_ragged, w1, b1, w2, b2)
    assert out_r.shape == (6, pm_dim_2)
    assert jnp.allclose(out_r, ref_r, atol=1e-5, rtol=1e-5)

    # Auto path (tiny batch -> plain jnp fallback) still matches the reference.
    out_auto = jax.block_until_ready(projection_forward(feat, w1, b1, w2, b2))
    assert jnp.allclose(out_auto, ref, atol=1e-5, rtol=1e-5)

    print("KERNEL_OK")
</pallas_src>

<mosaic_0001>
module attributes {stable_mosaic.version = 11 : i64} {
  func.func @_mlp_kernel(%arg0: i32, %arg1: memref<8x32xf32, #tpu.memory_space<vmem>>, %arg2: memref<32x64xf32, #tpu.memory_space<vmem>>, %arg3: memref<1x64xf32, #tpu.memory_space<vmem>>, %arg4: memref<64x16xf32, #tpu.memory_space<vmem>>, %arg5: memref<1x16xf32, #tpu.memory_space<vmem>>, %arg6: memref<8x16xf32, #tpu.memory_space<vmem>>) attributes {dimension_semantics = [#tpu.dimension_semantics<parallel>], iteration_bounds = array<i64: 1>, scalar_prefetch = 0 : i64, scratch_operands = 0 : i64, tpu.core_type = #tpu.core_type<tc>, window_params = [{transform_indices = @transform_0, window_bounds = array<i64: 8, 32>}, {pipeline_mode = #tpu.pipeline_mode<synchronous>, transform_indices = @transform_1, window_bounds = array<i64: 32, 64>}, {pipeline_mode = #tpu.pipeline_mode<synchronous>, transform_indices = @transform_2, window_bounds = array<i64: 1, 64>}, {pipeline_mode = #tpu.pipeline_mode<synchronous>, transform_indices = @transform_3, window_bounds = array<i64: 64, 16>}, {pipeline_mode = #tpu.pipeline_mode<synchronous>, transform_indices = @transform_4, window_bounds = array<i64: 1, 16>}, {transform_indices = @transform_5, window_bounds = array<i64: 8, 16>}]} {
    %c0 = arith.constant 0 : index
    %c0_0 = arith.constant 0 : index
    %0 = vector.load %arg1[%c0, %c0_0] : memref<8x32xf32, #tpu.memory_space<vmem>>, vector<8x32xf32>
    %c0_1 = arith.constant 0 : index
    %c0_2 = arith.constant 0 : index
    %1 = vector.load %arg2[%c0_1, %c0_2] : memref<32x64xf32, #tpu.memory_space<vmem>>, vector<32x64xf32>
    %cst = arith.constant dense<0.000000e+00> : vector<8x64xf32>
    %2 = tpu.matmul %0, %1, %cst {dimension_numbers = #tpu.dot_dimension_numbers<[1], [0], [0], [1], [0, 0, 1, 1], [], []>} : vector<8x32xf32>, vector<32x64xf32>, vector<8x64xf32> -> vector<8x64xf32>
    %c0_3 = arith.constant 0 : index
    %c0_4 = arith.constant 0 : index
    %3 = vector.load %arg3[%c0_3, %c0_4] : memref<1x64xf32, #tpu.memory_space<vmem>>, vector<1x64xf32>
    %4 = vector.broadcast %3 : vector<1x64xf32> to vector<8x64xf32>
    %5 = arith.addf %2, %4 : vector<8x64xf32>
    %cst_5 = arith.constant 0.000000e+00 : f32
    %6 = vector.broadcast %cst_5 : f32 to vector<8x64xf32>
    %7 = arith.maximumf %5, %6 : vector<8x64xf32>
    %c0_6 = arith.constant 0 : index
    %c0_7 = arith.constant 0 : index
    %8 = vector.load %arg4[%c0_6, %c0_7] : memref<64x16xf32, #tpu.memory_space<vmem>>, vector<64x16xf32>
    %cst_8 = arith.constant dense<0.000000e+00> : vector<8x16xf32>
    %9 = tpu.matmul %7, %8, %cst_8 {dimension_numbers = #tpu.dot_dimension_numbers<[1], [0], [0], [1], [0, 0, 1, 1], [], []>} : vector<8x64xf32>, vector<64x16xf32>, vector<8x16xf32> -> vector<8x16xf32>
    %c0_9 = arith.constant 0 : index
    %c0_10 = arith.constant 0 : index
    %10 = vector.load %arg5[%c0_9, %c0_10] : memref<1x16xf32, #tpu.memory_space<vmem>>, vector<1x16xf32>
    %11 = vector.broadcast %10 : vector<1x16xf32> to vector<8x16xf32>
    %12 = arith.addf %9, %11 : vector<8x16xf32>
    %c0_11 = arith.constant 0 : index
    %c0_12 = arith.constant 0 : index
    %13 = vector.load %arg6[%c0_11, %c0_12] : memref<8x16xf32, #tpu.memory_space<vmem>>, vector<8x16xf32>
    tpu.vector_store %arg6[%c0_11, %c0_12], %12 {strides = array<i32>} : memref<8x16xf32, #tpu.memory_space<vmem>>, vector<8x16xf32>,
    return
  }
  func.func @transform_0(%arg0: i32) -> (i32, i32) {
    %c0_i32 = arith.constant 0 : i32
    %c0_i32_0 = arith.constant 0 : i32
    return %arg0, %c0_i32 : i32, i32
  }
  func.func @transform_1(%arg0: i32) -> (i32, i32) {
    %c0_i32 = arith.constant 0 : i32
    %c0_i32_0 = arith.constant 0 : i32
    %c0_i32_1 = arith.constant 0 : i32
    return %c0_i32, %c0_i32_0 : i32, i32
  }
  func.func @transform_2(%arg0: i32) -> (i32, i32) {
    %c0_i32 = arith.constant 0 : i32
    %c0_i32_0 = arith.constant 0 : i32
    %c0_i32_1 = arith.constant 0 : i32
    return %c0_i32, %c0_i32_0 : i32, i32
  }
  func.func @transform_3(%arg0: i32) -> (i32, i32) {
    %c0_i32 = arith.constant 0 : i32
    %c0_i32_0 = arith.constant 0 : i32
    %c0_i32_1 = arith.constant 0 : i32
    return %c0_i32, %c0_i32_0 : i32, i32
  }
  func.func @transform_4(%arg0: i32) -> (i32, i32) {
    %c0_i32 = arith.constant 0 : i32
    %c0_i32_0 = arith.constant 0 : i32
    %c0_i32_1 = arith.constant 0 : i32
    return %c0_i32, %c0_i32_0 : i32, i32
  }
  func.func @transform_5(%arg0: i32) -> (i32, i32) {
    %c0_i32 = arith.constant 0 : i32
    %c0_i32_0 = arith.constant 0 : i32
    return %arg0, %c0_i32 : i32, i32
  }
}

</mosaic_0001>

<bundles_post_ra>
// kernel: projection_forward.1
= control target key start
LH: loop header
LB: loop body
LE: loop exit
PB: predicated region body
PF: predicated region fallthrough
CT: control target
= control target key end

     0   :  { %s219_s0 = inlined_call_operand.vmem [shape: f32[8,32], index: 0, kind: input, shape index: {}]   ;;  %s220_s1 = inlined_call_operand.vmem [shape: f32[32,64], index: 1, kind: input, shape index: {}]   ;;  %s221_s2 = inlined_call_operand.vmem [shape: f32[1,64], index: 2, kind: input, shape index: {}]   ;;  %s222_s3 = inlined_call_operand.vmem [shape: f32[64,16], index: 3, kind: input, shape index: {}]   ;;  %s223_s4 = inlined_call_operand.vmem [shape: f32[1,16], index: 4, kind: input, shape index: {}]   ;;  %s224_s5 = inlined_call_operand.hbm [shape: f32[8,16], index: 5, kind: output, shape index: {}]  }
   0x1   :  { %v25_v0 = vld [vmem:[%s220_s1 + $0x18] sm:$0xff]  ;;  %v24_v1 = vld [vmem:[%s220_s1 + $0x10] sm:$0xff]  ;;  %v23_v3 = vld [vmem:[%s220_s1 + $0x8] sm:$0xff] }
   0x2   :  { %46 = vmatpush.msra.mxu0 %v25_v0  ;;  %v62_v2 = vld [vmem:[%s222_s3 + $0x38] sm:$0xff]  ;;  %v61_v4 = vld [vmem:[%s222_s3 + $0x30] sm:$0xff]  ;;  %v60_v5 = vld [vmem:[%s222_s3 + $0x28] sm:$0xff] }
   0x3   :  { %79 = vmatpush.msra.mxu1 %v62_v2  ;;  %v22_v6 = vld [vmem:[%s220_s1] sm:$0xff] }
   0x4   :  { %47 = vmatpush.msra.mxu0 %v24_v1 }
   0x5   :  { %80 = vmatpush.msra.mxu1 %v61_v4 }
   0x6   :  { %10 = vsyncpa [#allocation3], 0  ;;  %48 = vmatpush.msra.mxu0 %v23_v3  ;;  %v21_v7 = vld [vmem:[%s219_s0] sm:$0xff]  ;;  %vm30_vm0 = vcmask 261120   ;;  %v58_v9 = vld [vmem:[%s222_s3 + $0x18] sm:$0xff]  ;;  %vm67_vm1 = vcmask 523264  }
   0x7   :  { %v59_v8 = vld [vmem:[%s222_s3 + $0x20] sm:$0xff]  ;;  %81 = vmatpush.msra.mxu1 %v60_v5  ;;  %v57_v10 = vld [vmem:[%s222_s3 + $0x10] sm:$0xff]  ;;  %v56_v11 = vld [vmem:[%s222_s3 + $0x8] sm:$0xff]  ;;  %s140_s21 = smov [#allocation2]   ;;  %vm91_vm2 = vcmask 130048  }
   0x8   :  { %49 = vmatpush.msra.mxu0 %v22_v6  ;;  %v55_v12 = vld [vmem:[%s222_s3] sm:$0xff]  ;;  %s98_s22 = sshll.u32 %s140_s21, 4  ;;  %s100_s3 = sshll.u32 %s224_s5, 4  ;;  %s99_s22 = int_to_ptr.vmem [resolvable:$true] %s98_s22  ;;  %s101_s3 = int_to_ptr.hbm [resolvable:$true] %s100_s3 }
   0x9   :  { %109 = vmatmul.msk.f32.vlgmr.msra.gmra.mxu0 %vm30_vm0, %v21_v7  ;;  %82 = vmatpush.msra.mxu1 %v59_v8  ;;  %v112_v13 = vld [vmem:[%s221_s2] ss:$0 sm:$0xff] }
   0xa   :  { %v113_v17 = vld [vmem:[%s223_s4] ss:$0 sm:$0xff] }
   0xb   :  { %83 = vmatpush.msra.mxu1 %v58_v9 }
   0xd   :  { %84 = vmatpush.msra.mxu1 %v57_v10 }
   0xf   :  { %85 = vmatpush.msra.mxu1 %v56_v11 }
  0x11   :  { %86 = vmatpush.msra.mxu1 %v55_v12 }
  0x86   :  { %v51_v14 = vpop.f32.mrf.mxu0 }
  0x87   :  { %v52_v15 = vadd.f32 %v112_v13, %v51_v14 }
  0x89   :  { %v54_v16 = vmax.f32 %v52_v15, 0.0 }
  0x8b   :  { %110 = vmatmul.msk.f32.vlgmr.msra.gmra.mxu1 %vm67_vm1, %v54_v16 }
 0x108   :  { %v88_v18 = vpop.f32.mrf.mxu1 }
 0x109   :  { %v89_v19 = vadd.f32 %v113_v17, %v88_v18 }
 0x10b   :  { %92 = vst.msk [vmem:[#allocation2] sm:$0xff] %vm91_vm2, %v89_v19 }
 0x10c   :  { %103 = dma.vmem_to_hbm [thread:$0]  %s99_s22, 128, %s101_s3, [#allocation3]  }
 0x10d   :  { %138 = dma.done.wait [#allocation3], 128  }
 0x10e   :  { %139 = vsyncadd [#allocation3], 4294967168 }
 0x10f   :  { %108 = vsyncpa [#allocation3], 1 }

</bundles_post_ra>
